<compile_context>
chip_gen: v7x
topology: tpu7x:2x2x1
jax: 0.10.0
libtpu: 0.0.40
codegen_flags: <defaults>
</compile_context>

<pallas_src>
import functools

import jax
import jax.numpy as jnp
from jax.experimental import pallas as pl
from jax.experimental.pallas import tpu as pltpu

_LN_EPS = 1e-5
_INV_SQRT2 = 0.7071067811865476
_SQRT_2_OVER_PI = 0.7978845608028654


def _round_up(a: int, b: int) -> int:
    return (a + b - 1) // b * b


def _gelu_f32(h, approx: bool):
    if approx:
        # Cheaper tanh approximation (use when tolerance allows; exact erf is the
        # nn.GELU() default and is kept as the default here).
        c = jnp.float32(_SQRT_2_OVER_PI)
        return 0.5 * h * (1.0 + jnp.tanh(c * (h + jnp.float32(0.044715) * h * h * h)))
    return 0.5 * h * (1.0 + jax.lax.erf(h * jnp.float32(_INV_SQRT2)))


def _layernorm_f32(x, g, b):
    mean = jnp.mean(x, axis=-1, keepdims=True)
    xc = x - mean
    var = jnp.mean(xc * xc, axis=-1, keepdims=True)        # two-pass: robust variance
    return xc * jax.lax.rsqrt(var + jnp.float32(_LN_EPS)) * g + b


# ----------------------------------------------------------------------------
# Kernels
# ----------------------------------------------------------------------------
def _ibn_fused_kernel(x_ref, g_ref, beta_ref, w1_ref, b1_ref, w2_ref, b2_ref, o_ref,
                      *, approx_gelu):
    """Weight-resident path: whole W1/W2 live in VMEM; grid is over row tiles only."""
    x = x_ref[...].astype(jnp.float32)
    xn = _layernorm_f32(x, g_ref[...].astype(jnp.float32),
                        beta_ref[...].astype(jnp.float32))
    h = jnp.dot(xn.astype(w1_ref.dtype), w1_ref[...],
                preferred_element_type=jnp.float32)
    h = _gelu_f32(h + b1_ref[...].astype(jnp.float32), approx_gelu)
    # Dropout(p=0.0) -> identity.
    y = jnp.dot(h.astype(w2_ref.dtype), w2_ref[...],
                preferred_element_type=jnp.float32)
    o_ref[...] = (y + b2_ref[...].astype(jnp.float32) + x).astype(o_ref.dtype)


def _ibn_tiled_kernel(x_ref, g_ref, beta_ref, w1_ref, b1_ref, w2_ref, b2_ref, o_ref,
                      *scratch, approx_gelu, acc_in_output):
    """E-chunked path: accumulate W2 @ GELU(...) chunks across the trailing grid axis."""
    if acc_in_output:
        (xn_ref,) = scratch
        acc_ref = o_ref                       # f32 output block is resident across k
    else:
        acc_ref, xn_ref = scratch

    k = pl.program_id(1)

    @pl.when(k == 0)
    def _init():
        # LayerNorm once per row tile; cache normalized activations for all E chunks.
        x = x_ref[...].astype(jnp.float32)
        xn = _layernorm_f32(x, g_ref[...].astype(jnp.float32),
                            beta_ref[...].astype(jnp.float32))
        xn_ref[...] = xn.astype(xn_ref.dtype)
        acc_ref[...] = jnp.zeros_like(acc_ref)

    # ---- Linear(dim -> E chunk) + GELU on this E slab ----
    h = jnp.dot(xn_ref[...], w1_ref[...], preferred_element_type=jnp.float32)
    h = _gelu_f32(h + b1_ref[...].astype(jnp.float32), approx_gelu)

    # Dropout(p=0.0) -> identity.

    # ---- Linear(E chunk -> dim), accumulate (f32) ----
    acc_ref[...] += jnp.dot(h.astype(w2_ref.dtype), w2_ref[...],
                            preferred_element_type=jnp.float32).astype(acc_ref.dtype)

    @pl.when(k == pl.num_programs(1) - 1)
    def _finalize():
        y = (acc_ref[...].astype(jnp.float32)
             + b2_ref[...].astype(jnp.float32)
             + x_ref[...].astype(jnp.float32))
        o_ref[...] = y.astype(o_ref.dtype)


# ----------------------------------------------------------------------------
# Tiling / VMEM sizing helpers
# ----------------------------------------------------------------------------
def _vmem_capacity_bytes() -> int:
    cap = 64 << 20  # conservative default: v7x per-TensorCore VMEM
    try:
        info = pltpu.get_tpu_info()
        cap = int(getattr(info, "vmem_capacity_bytes", cap)) or cap
    except Exception:
        pass
    return cap


def _best_divisor(n: int, cap: int) -> int:
    """Largest divisor of n <= cap, preferring multiples of 256 (v6e/v7x MXU), then 128."""
    cap = max(1, min(cap, n))
    divs = [d for d in range(1, cap + 1) if n % d == 0]
    for mult in (256, 128):
        good = [d for d in divs if d % mult == 0]
        if good:
            return max(good)
    return n  # no lane-aligned divisor: use the full dim (block == array extent)


def _fused_vmem_bytes(tm, D, E, x_item, w_item):
    return (4 * tm * D * x_item            # x + out blocks (double-buffered)
            + 4 * D * E * w_item           # W1 + W2 (2 buffers each; fetched once)
            + 2 * (E + 3 * D) * 4          # biases / gamma / beta
            + tm * E * 4                   # h temporary (f32)
            + 2 * tm * D * 4)              # xn / y temporaries (f32)


def _tiled_vmem_bytes(tm, te, D, x_item, w_item, acc_scratch):
    v = (4 * tm * D * x_item               # x + out blocks
         + 4 * D * te * w_item             # W1/W2 chunks (double-buffered)
         + 2 * (te + 3 * D) * 4            # biases / gamma / beta
         + tm * te * 4                     # h temporary (f32)
         + tm * D * w_item)                # cached LayerNorm(x)
    if acc_scratch:
        v += tm * D * 4                    # f32 accumulator
    return v


# ----------------------------------------------------------------------------
# Wrapper
# ----------------------------------------------------------------------------
def inverted_bottleneck_mlp(x, gamma, beta, w1, b1, w2, b2, *,
                            tile_m=None, tile_e=None, path="auto",
                            approx_gelu=False):
    """InvertedBottleneckMLP forward: y = x + W2 @ GELU(W1 @ LN(x) + b1) + b2.

    x: (B, S, D). Weights pre-transposed vs torch: w1 (D, E), w2 (E, D).
    Weights may be bf16 (f32 MXU accumulation); LayerNorm/GELU math stays f32.
    path: "auto" | "fused" (weight-resident) | "tiled" (E-chunked).
    """
    B, S, D = x.shape
    E = w1.shape[1]
    M = B * S

    x_item = jnp.dtype(x.dtype).itemsize
    w_item = jnp.dtype(w1.dtype).itemsize

    cap = _vmem_capacity_bytes()
    budget = int(cap * 0.85)               # headroom for Mosaic internals

    # ---- token-tile (M axis) selection ----------------------------------------
    # Arithmetic intensity of the tiled path is ~2*tile_m/itemsize flops per weight
    # byte, so keep row tiles large (target 1024). Also keep >= 2 row tiles so the
    # "parallel" M axis can shard across v7x's two TensorCores.
    tm_target = 1024 if tile_m is None else int(tile_m)
    half_m = _round_up((M + 1) // 2, 8)
    tm = min(_round_up(max(tm_target, 8), 8), _round_up(M, 8), max(half_m, 8))
    if tm > 256:
        tm = (tm // 256) * 256             # MXU-friendly multiple of 256

    use_acc_scratch = x.dtype != jnp.float32   # f32 outputs accumulate in-place in o_ref

    # ---- path selection --------------------------------------------------------
    tm_f = tm
    while tm_f > 8 and _fused_vmem_bytes(tm_f, D, E, x_item, w_item) > budget:
        tm_f = _round_up(max(8, tm_f // 2), 8)
    fused_fits = _fused_vmem_bytes(tm_f, D, E, x_item, w_item) <= budget
    if path == "fused":
        use_fused = True
    elif path == "tiled":
        use_fused = False
    else:
        use_fused = fused_fits and tm_f >= min(tm, 256)

    if use_fused:
        tm = tm_f
        M_pad = _round_up(M, tm)
        grid_m = M_pad // tm
        est = _fused_vmem_bytes(tm, D, E, x_item, w_item)

        grid = (grid_m,)
        kernel = functools.partial(_ibn_fused_kernel, approx_gelu=approx_gelu)
        in_specs = [
            pl.BlockSpec((tm, D), lambda i: (i, 0)),      # x rows
            pl.BlockSpec((1, D), lambda i: (0, 0)),       # gamma
            pl.BlockSpec((1, D), lambda i: (0, 0)),       # beta
            pl.BlockSpec((D, E), lambda i: (0, 0)),       # W1 (resident, fetched once)
            pl.BlockSpec((1, E), lambda i: (0, 0)),       # b1
            pl.BlockSpec((E, D), lambda i: (0, 0)),       # W2 (resident, fetched once)
            pl.BlockSpec((1, D), lambda i: (0, 0)),       # b2
        ]
        out_specs = pl.BlockSpec((tm, D), lambda i: (i, 0))
        scratch_shapes = []
        dim_sem = ("parallel",)
        bytes_accessed = (2 * M_pad * D * x_item          # x in + out
                          + 2 * D * E * w_item            # weights once
                          + (E + 3 * D) * 4)
    else:
        te_target = 512 if tile_e is None else int(tile_e)
        te = _best_divisor(E, min(te_target, E))
        # Shrink tile_e first (keep >= 256 while possible), then tile_m; tile_m
        # carries the arithmetic-intensity win.
        while _tiled_vmem_bytes(tm, te, D, x_item, w_item, use_acc_scratch) > budget:
            if te > 256:
                new_te = _best_divisor(E, te // 2)
                if new_te < te:
                    te = new_te
                    continue
            if tm > 256:
                tm = max(256, ((tm // 2) // 256) * 256)
                continue
            if te > 128:
                new_te = _best_divisor(E, te // 2)
                if new_te < te:
                    te = new_te
                    continue
            if tm > 8:
                tm = _round_up(max(8, tm // 2), 8)
                continue
            break

        M_pad = _round_up(M, tm)
        grid_m = M_pad // tm
        grid_e = E // te
        est = _tiled_vmem_bytes(tm, te, D, x_item, w_item, use_acc_scratch)

        grid = (grid_m, grid_e)
        kernel = functools.partial(_ibn_tiled_kernel, approx_gelu=approx_gelu,
                                   acc_in_output=not use_acc_scratch)
        in_specs = [
            pl.BlockSpec((tm, D), lambda i, k: (i, 0)),   # x rows
            pl.BlockSpec((1, D), lambda i, k: (0, 0)),    # gamma
            pl.BlockSpec((1, D), lambda i, k: (0, 0)),    # beta
            pl.BlockSpec((D, te), lambda i, k: (0, k)),   # W1 chunk
            pl.BlockSpec((1, te), lambda i, k: (0, k)),   # b1 chunk
            pl.BlockSpec((te, D), lambda i, k: (k, 0)),   # W2 chunk
            pl.BlockSpec((1, D), lambda i, k: (0, 0)),    # b2
        ]
        out_specs = pl.BlockSpec((tm, D), lambda i, k: (i, 0))
        scratch_shapes = [pltpu.VMEM((tm, D), w1.dtype)]  # cached LayerNorm(x)
        if use_acc_scratch:
            scratch_shapes = [pltpu.VMEM((tm, D), jnp.float32)] + scratch_shapes
        dim_sem = ("parallel", "arbitrary")
        bytes_accessed = (2 * M_pad * D * x_item
                          + grid_m * 2 * D * E * w_item   # weight restream per row tile
                          + grid_m * (E + 3 * D) * 4)

    # ---- operand prep ----------------------------------------------------------
    x2 = x.reshape(M, D)
    if M_pad != M:
        x2 = jnp.pad(x2, ((0, M_pad - M), (0, 0)))        # padded rows computed, dropped

    gamma2 = gamma.reshape(1, D)
    beta2 = beta.reshape(1, D)
    b1_2 = b1.reshape(1, E)
    b2_2 = b2.reshape(1, D)

    # VMEM limit: enough for the estimate, never above ~92% of physical capacity.
    vmem_limit = min(int(cap * 0.92), max(32 << 20, int(est * 1.6)))

    cost = pl.CostEstimate(
        flops=4 * M_pad * D * E,                          # two matmuls, 2*M*D*E each
        transcendentals=M_pad * E,                        # erf / tanh
        bytes_accessed=int(bytes_accessed),
    )

    out = pl.pallas_call(
        kernel,
        out_shape=jax.ShapeDtypeStruct((M_pad, D), x.dtype),
        grid_spec=pltpu.PrefetchScalarGridSpec(
            num_scalar_prefetch=0,
            grid=grid,
            in_specs=in_specs,
            out_specs=out_specs,
            scratch_shapes=scratch_shapes,
        ),
        compiler_params=pltpu.CompilerParams(
            dimension_semantics=dim_sem,
            vmem_limit_bytes=int(vmem_limit),
        ),
        cost_estimate=cost,
    )(x2, gamma2, beta2, w1, b1_2, w2, b2_2)

    return out[:M].reshape(B, S, D)


# ----------------------------------------------------------------------------
# Reference + demo
# ----------------------------------------------------------------------------
def _reference(x, gamma, beta, w1, b1, w2, b2):
    xf = x.astype(jnp.float32)
    mean = jnp.mean(xf, axis=-1, keepdims=True)
    var = jnp.mean((xf - mean) ** 2, axis=-1, keepdims=True)
    xn = (xf - mean) / jnp.sqrt(var + _LN_EPS) * gamma.astype(jnp.float32) \
        + beta.astype(jnp.float32)
    h = xn @ w1.astype(jnp.float32) + b1.astype(jnp.float32)
    h = 0.5 * h * (1.0 + jax.lax.erf(h / jnp.sqrt(2.0)))
    y = h @ w2.astype(jnp.float32) + b2.astype(jnp.float32)
    return (xf + y).astype(x.dtype)


if __name__ == "__main__":
    # Small but lane-dense shapes; B*S = 20 (non-multiple of 8) exercises padded tail.
    B, S, D = 2, 10, 128
    expansion_factor = 4
    E = int(expansion_factor * D)          # 512

    key = jax.random.PRNGKey(0)
    kx, k1, k2, k3, k4, k5, k6 = jax.random.split(key, 7)

    x = jax.random.normal(kx, (B, S, D), dtype=jnp.float32)
    gamma = 1.0 + 0.1 * jax.random.normal(k5, (D,), dtype=jnp.float32)
    beta = 0.1 * jax.random.normal(k6, (D,), dtype=jnp.float32)
    w1 = jax.random.normal(k1, (D, E), dtype=jnp.float32) * (1.0 / jnp.sqrt(D))
    b1 = jax.random.normal(k2, (E,), dtype=jnp.float32) * 0.01
    w2 = jax.random.normal(k3, (E, D), dtype=jnp.float32) * (1.0 / jnp.sqrt(E))
    b2 = jax.random.normal(k4, (D,), dtype=jnp.float32) * 0.01

    ref = _reference(x, gamma, beta, w1, b1, w2, b2)

    # 1) auto path: weights fit in VMEM -> fused weight-resident kernel (no E axis,
    #    weights fetched once); M split into >=2 row tiles (v7x TC sharding).
    fn = jax.jit(inverted_bottleneck_mlp)
    out = jax.block_until_ready(fn(x, gamma, beta, w1, b1, w2, b2))
    assert out.shape == (B, S, D)
    assert jnp.allclose(out, ref, atol=2e-4, rtol=2e-4), "fused path mismatch"

    # 2) forced E-chunked path: exercises k-accumulation + init/finalize gating,
    #    accumulating directly into the resident f32 output block.
    fn_t = jax.jit(functools.partial(inverted_bottleneck_mlp, path="tiled", tile_e=256))
    out_t = jax.block_until_ready(fn_t(x, gamma, beta, w1, b1, w2, b2))
    assert jnp.allclose(out_t, ref, atol=2e-4, rtol=2e-4), "tiled path mismatch"

    # 3) bf16 weights (halves weight HBM traffic / doubles MXU rate; f32 accumulation).
    w1b, w2b = w1.astype(jnp.bfloat16), w2.astype(jnp.bfloat16)
    out_b = jax.block_until_ready(fn(x, gamma, beta, w1b, b1, w2b, b2))
    ref_b = _reference(x, gamma, beta, w1b, b1, w2b, b2)
    assert jnp.allclose(out_b, ref_b, atol=3e-2, rtol=3e-2), "bf16-weight path mismatch"

    # TODO(synk): use_selu=True branch (SELU + AlphaDropout, Identity norm) and
    # training-mode dropout (p > 0) are not implemented; p = 0.0 default is identity.
    print("KERNEL_OK")
</pallas_src>

<mosaic_0001>
module attributes {stable_mosaic.version = 11 : i64} {
  func.func @_ibn_fused_kernel(%arg0: i32, %arg1: memref<16x128xf32, #tpu.memory_space<vmem>>, %arg2: memref<1x128xf32, #tpu.memory_space<vmem>>, %arg3: memref<1x128xf32, #tpu.memory_space<vmem>>, %arg4: memref<128x512xf32, #tpu.memory_space<vmem>>, %arg5: memref<1x512xf32, #tpu.memory_space<vmem>>, %arg6: memref<512x128xf32, #tpu.memory_space<vmem>>, %arg7: memref<1x128xf32, #tpu.memory_space<vmem>>, %arg8: memref<16x128xf32, #tpu.memory_space<vmem>>) attributes {dimension_semantics = [#tpu.dimension_semantics<parallel>], iteration_bounds = array<i64: 2>, scalar_prefetch = 0 : i64, scratch_operands = 0 : i64, tpu.core_type = #tpu.core_type<tc>, window_params = [{transform_indices = @transform_0, window_bounds = array<i64: 16, 128>}, {pipeline_mode = #tpu.pipeline_mode<synchronous>, transform_indices = @transform_1, window_bounds = array<i64: 1, 128>}, {pipeline_mode = #tpu.pipeline_mode<synchronous>, transform_indices = @transform_2, window_bounds = array<i64: 1, 128>}, {pipeline_mode = #tpu.pipeline_mode<synchronous>, transform_indices = @transform_3, window_bounds = array<i64: 128, 512>}, {pipeline_mode = #tpu.pipeline_mode<synchronous>, transform_indices = @transform_4, window_bounds = array<i64: 1, 512>}, {pipeline_mode = #tpu.pipeline_mode<synchronous>, transform_indices = @transform_5, window_bounds = array<i64: 512, 128>}, {pipeline_mode = #tpu.pipeline_mode<synchronous>, transform_indices = @transform_6, window_bounds = array<i64: 1, 128>}, {transform_indices = @transform_7, window_bounds = array<i64: 16, 128>}]} {
    %c0 = arith.constant 0 : index
    %c0_0 = arith.constant 0 : index
    %0 = vector.load %arg1[%c0, %c0_0] : memref<16x128xf32, #tpu.memory_space<vmem>>, vector<16x128xf32>
    %c0_1 = arith.constant 0 : index
    %c0_2 = arith.constant 0 : index
    %1 = vector.load %arg2[%c0_1, %c0_2] : memref<1x128xf32, #tpu.memory_space<vmem>>, vector<1x128xf32>
    %c0_3 = arith.constant 0 : index
    %c0_4 = arith.constant 0 : index
    %2 = vector.load %arg3[%c0_3, %c0_4] : memref<1x128xf32, #tpu.memory_space<vmem>>, vector<1x128xf32>
    %cst = arith.constant dense<0.000000e+00> : vector<16xf32>
    %3 = vector.multi_reduction <add>, %0, %cst [1] : vector<16x128xf32> to vector<16xf32>
    %4 = vector.shape_cast %3 : vector<16xf32> to vector<16x1xf32>
    %cst_5 = arith.constant 1.280000e+02 : f32
    %5 = vector.broadcast %cst_5 : f32 to vector<16x1xf32>
    %6 = arith.divf %4, %5 : vector<16x1xf32>
    %7 = vector.broadcast %6 : vector<16x1xf32> to vector<16x128xf32>
    %8 = arith.subf %0, %7 : vector<16x128xf32>
    %9 = arith.mulf %8, %8 : vector<16x128xf32>
    %cst_6 = arith.constant dense<0.000000e+00> : vector<16xf32>
    %10 = vector.multi_reduction <add>, %9, %cst_6 [1] : vector<16x128xf32> to vector<16xf32>
    %11 = vector.shape_cast %10 : vector<16xf32> to vector<16x1xf32>
    %cst_7 = arith.constant 1.280000e+02 : f32
    %12 = vector.broadcast %cst_7 : f32 to vector<16x1xf32>
    %13 = arith.divf %11, %12 : vector<16x1xf32>
    %cst_8 = arith.constant 9.99999974E-6 : f32
    %14 = vector.broadcast %cst_8 : f32 to vector<16x1xf32>
    %15 = arith.addf %13, %14 : vector<16x1xf32>
    %16 = math.rsqrt %15 : vector<16x1xf32>
    %17 = vector.broadcast %16 : vector<16x1xf32> to vector<16x128xf32>
    %18 = arith.mulf %8, %17 : vector<16x128xf32>
    %19 = vector.broadcast %1 : vector<1x128xf32> to vector<16x128xf32>
    %20 = arith.mulf %18, %19 : vector<16x128xf32>
    %21 = vector.broadcast %2 : vector<1x128xf32> to vector<16x128xf32>
    %22 = arith.addf %20, %21 : vector<16x128xf32>
    %c0_9 = arith.constant 0 : index
    %c0_10 = arith.constant 0 : index
    %23 = vector.load %arg4[%c0_9, %c0_10] : memref<128x512xf32, #tpu.memory_space<vmem>>, vector<128x512xf32>
    %cst_11 = arith.constant dense<0.000000e+00> : vector<16x512xf32>
    %24 = tpu.matmul %22, %23, %cst_11 {dimension_numbers = #tpu.dot_dimension_numbers<[1], [0], [0], [1], [0, 0, 1, 1], [], []>} : vector<16x128xf32>, vector<128x512xf32>, vector<16x512xf32> -> vector<16x512xf32>
    %c0_12 = arith.constant 0 : index
    %c0_13 = arith.constant 0 : index
    %25 = vector.load %arg5[%c0_12, %c0_13] : memref<1x512xf32, #tpu.memory_space<vmem>>, vector<1x512xf32>
    %26 = vector.broadcast %25 : vector<1x512xf32> to vector<16x512xf32>
    %27 = arith.addf %24, %26 : vector<16x512xf32>
    %cst_14 = arith.constant 5.000000e-01 : f32
    %28 = vector.broadcast %cst_14 : f32 to vector<16x512xf32>
    %29 = arith.mulf %28, %27 : vector<16x512xf32>
    %cst_15 = arith.constant 0.707106769 : f32
    %30 = vector.broadcast %cst_15 : f32 to vector<16x512xf32>
    %31 = arith.mulf %27, %30 : vector<16x512xf32>
    %32 = math.erf %31 : vector<16x512xf32>
    %cst_16 = arith.constant 1.000000e+00 : f32
    %33 = vector.broadcast %cst_16 : f32 to vector<16x512xf32>
    %34 = arith.addf %33, %32 : vector<16x512xf32>
    %35 = arith.mulf %29, %34 : vector<16x512xf32>
    %c0_17 = arith.constant 0 : index
    %c0_18 = arith.constant 0 : index
    %36 = vector.load %arg6[%c0_17, %c0_18] : memref<512x128xf32, #tpu.memory_space<vmem>>, vector<512x128xf32>
    %cst_19 = arith.constant dense<0.000000e+00> : vector<16x128xf32>
    %37 = tpu.matmul %35, %36, %cst_19 {dimension_numbers = #tpu.dot_dimension_numbers<[1], [0], [0], [1], [0, 0, 1, 1], [], []>} : vector<16x512xf32>, vector<512x128xf32>, vector<16x128xf32> -> vector<16x128xf32>
    %c0_20 = arith.constant 0 : index
    %c0_21 = arith.constant 0 : index
    %38 = vector.load %arg7[%c0_20, %c0_21] : memref<1x128xf32, #tpu.memory_space<vmem>>, vector<1x128xf32>
    %39 = vector.broadcast %38 : vector<1x128xf32> to vector<16x128xf32>
    %40 = arith.addf %37, %39 : vector<16x128xf32>
    %41 = arith.addf %40, %0 : vector<16x128xf32>
    %c0_22 = arith.constant 0 : index
    %c0_23 = arith.constant 0 : index
    %42 = vector.load %arg8[%c0_22, %c0_23] : memref<16x128xf32, #tpu.memory_space<vmem>>, vector<16x128xf32>
    tpu.vector_store %arg8[%c0_22, %c0_23], %41 {strides = array<i32>} : memref<16x128xf32, #tpu.memory_space<vmem>>, vector<16x128xf32>,
    return
  }
  func.func @transform_0(%arg0: i32) -> (i32, i32) {
    %c0_i32 = arith.constant 0 : i32
    %c0_i32_0 = arith.constant 0 : i32
    return %arg0, %c0_i32 : i32, i32
  }
  func.func @transform_1(%arg0: i32) -> (i32, i32) {
    %c0_i32 = arith.constant 0 : i32
    %c0_i32_0 = arith.constant 0 : i32
    %c0_i32_1 = arith.constant 0 : i32
    return %c0_i32, %c0_i32_0 : i32, i32
  }
  func.func @transform_2(%arg0: i32) -> (i32, i32) {
    %c0_i32 = arith.constant 0 : i32
    %c0_i32_0 = arith.constant 0 : i32
    %c0_i32_1 = arith.constant 0 : i32
    return %c0_i32, %c0_i32_0 : i32, i32
  }
  func.func @transform_3(%arg0: i32) -> (i32, i32) {
    %c0_i32 = arith.constant 0 : i32
    %c0_i32_0 = arith.constant 0 : i32
    %c0_i32_1 = arith.constant 0 : i32
    return %c0_i32, %c0_i32_0 : i32, i32
  }
  func.func @transform_4(%arg0: i32) -> (i32, i32) {
    %c0_i32 = arith.constant 0 : i32
    %c0_i32_0 = arith.constant 0 : i32
    %c0_i32_1 = arith.constant 0 : i32
    return %c0_i32, %c0_i32_0 : i32, i32
  }
  func.func @transform_5(%arg0: i32) -> (i32, i32) {
    %c0_i32 = arith.constant 0 : i32
    %c0_i32_0 = arith.constant 0 : i32
    %c0_i32_1 = arith.constant 0 : i32
    return %c0_i32, %c0_i32_0 : i32, i32
  }
  func.func @transform_6(%arg0: i32) -> (i32, i32) {
    %c0_i32 = arith.constant 0 : i32
    %c0_i32_0 = arith.constant 0 : i32
    %c0_i32_1 = arith.constant 0 : i32
    return %c0_i32, %c0_i32_0 : i32, i32
  }
  func.func @transform_7(%arg0: i32) -> (i32, i32) {
    %c0_i32 = arith.constant 0 : i32
    %c0_i32_0 = arith.constant 0 : i32
    return %arg0, %c0_i32 : i32, i32
  }
}

</mosaic_0001>

<bundles_post_ra>
// kernel: inverted_bottleneck_mlp.1
= control target key start
LH: loop header
LB: loop body
LE: loop exit
PB: predicated region body
PF: predicated region fallthrough
CT: control target
= control target key end

     0   :  { %12 = vsyncpa [#allocation3], 0  ;;  %s1472_s0 = inlined_call_operand.vmem [shape: f32[32,128], index: 0, kind: input, shape index: {}]   ;;  %s1473_s1 = inlined_call_operand.vmem [shape: f32[1,128], index: 1, kind: input, shape index: {}]   ;;  %s1474_s2 = inlined_call_operand.vmem [shape: f32[1,128], index: 2, kind: input, shape index: {}]   ;;  %s1475_s3 = inlined_call_operand.hbm [shape: f32[128,512], index: 3, kind: input, shape index: {}]   ;;  %s1476_s4 = inlined_call_operand.vmem [shape: f32[1,512], index: 4, kind: input, shape index: {}]   ;;  %s1477_s5 = inlined_call_operand.hbm [shape: f32[512,128], index: 5, kind: input, shape index: {}]   ;;  %s1478_s6 = inlined_call_operand.vmem [shape: f32[1,128], index: 6, kind: input, shape index: {}]   ;;  %s1479_s7 = inlined_call_operand.vmem [shape: f32[32,128], index: 7, kind: output, shape index: {}]  }
   0x1   :  { %13 = vsyncpa [#allocation5], 0  ;;  %s1333_s24 = smov 0  }
   0x2 LB: > { %s1286_s25 = smov [#allocation2]   ;;  %s938_s27 = sadd.s32 4294967295, %s1284_s24   ;;  %s1284_s24 = sphi %s1333_s24, %s19_s24  }
   0x3   : > { %s220_s26 = sshll.u32 %s1286_s25, 4  ;;  %p940_p0 = scmp.ge.s32.totalorder %s1284_s24, 1  ;;  %s221_s26 = int_to_ptr.vmem [resolvable:$true] %s220_s26 }
   0x4   : > { %p202_p1 = scmp.lt.s32.totalorder %s1284_s24, 3  ;;  %p1347_p3 = scmp.eq.s32.totalorder %s938_s27, 0 }
   0x5   : > { %s1287_s30 = smov [#allocation4]   ;;  %s1214_s12 = scalar_lea.hbm %s1475_s3, 8192 }
   0x6   : > { %p1341_p2 = pnand %p940_p0, %p202_p1  ;;  %s236_s8 = sshll.u32 %s1287_s30, 4  ;;  %s1359_s8 = int_to_ptr.vmem [resolvable:$true] %s236_s8 }
   0x7   : > { %s1484_s29 = scalar_select %p1347_p3, 1, 0 }
   0x8   : > { %s1483_s28 = scalar_select %p1341_p2, 1, 0 }
   0x9   : > { %p1168_p4 = pneg %p1341_p2  ;;  %p1215_p6 = scmp.ne.s32.totalorder %s1475_s3, %s1214_s12 }
   0xa   : > { %p1221_p10 = scmp.lt.u32.totalorder %s1214_s12, %s1475_s3 }
   0xb   : > { %p1355_p5 = pnand %p1347_p3, %p1168_p4 }
   0xd   : > { %p1216_p7 = pneg %p1355_p5 }
   0xf   : > { %p1217_p8 = pnand %p1216_p7, %p1215_p6 }
  0x11   : > { %p1218_p9 = pneg %p1217_p8 }
  0x13   : > { %p1223_p11 = pnand %p1221_p10, %p1218_p9 }
  0x15   : > { %1226 = shalt.err (!%p1223_p11)
}
  0x16   : > { %s1227_s17 = scalar_lea.vmem %s221_s26, 8192  ;;  %p1235_p1 = scmp.lt.s32.totalorder %s221_s26, %s221_s26 }
  0x17   : > { %p1228_p12 = scmp.ne.s32.totalorder %s221_s26, %s1227_s17  ;;  %p1236_p4 = scmp.lt.s32.totalorder %s1227_s17, %s1227_s17 }
  0x19   : > { %p1230_p13 = pnand %p1228_p12, %p1216_p7  ;;  %p1237_p3 = por %p1236_p4, %p1235_p1 }
  0x1b   : > { %p1231_p0 = pneg %p1230_p13 }
  0x1d   : > { %p1238_p2 = pnand %p1237_p3, %p1231_p0 }
  0x1f   : > { %1241 = shalt.err (!%p1238_p2)
}
  0x20   : > { %s1288_s18 = smov 512   ;;  %s1289_s19 = smov 32  }
  0x21   : > { %1171 = dma.hbm_to_vmem [thread:$0]  (!%p1355_p5), %s1475_s3, 8192, %s221_s26, [#allocation3], %s1288_s18, %s1288_s18, %s1289_s19  }
  0x22   : > { %s1242_s25 = scalar_lea.hbm %s1477_s5, 8192 }
  0x23   : > { %p1243_p6 = scmp.ne.s32.totalorder %s1477_s5, %s1242_s25  ;;  %p1249_p8 = scmp.lt.u32.totalorder %s1242_s25, %s1477_s5 }
  0x25   : > { %p1245_p2 = pnand %p1243_p6, %p1216_p7 }
  0x27   : > { %p1246_p3 = pneg %p1245_p2 }
  0x29   : > { %p1251_p9 = pnand %p1249_p8, %p1246_p3 }
  0x2b   : > { %1254 = shalt.err (!%p1251_p9)
}
  0x2c   : > { %s1255_s26 = scalar_lea.vmem %s1359_s8, 8192  ;;  %p1263_p13 = scmp.lt.s32.totalorder %s1359_s8, %s1359_s8 }
  0x2d   : > { %p1256_p10 = scmp.ne.s32.totalorder %s1359_s8, %s1255_s26  ;;  %p1264_p0 = scmp.lt.s32.totalorder %s1255_s26, %s1255_s26 }
  0x2f   : > { %p1258_p11 = pnand %p1256_p10, %p1216_p7  ;;  %p1265_p1 = por %p1264_p0, %p1263_p13 }
  0x31   : > { %p1259_p12 = pneg %p1258_p11 }
  0x33   : > { %p1266_p4 = pnand %p1265_p1, %p1259_p12 }
  0x35   : > { %1269 = shalt.err (!%p1266_p4)
}
  0x36   : > { %s1290_s13 = smov 128   ;;  %s1291_s14 = smov 8  }
  0x37   : > { %1174 = dma.hbm_to_vmem [thread:$0]  (!%p1355_p5), %s1477_s5, 8192, %s1359_s8, [#allocation5], %s1290_s13, %s1290_s13, %s1291_s14  }
  0x38   : > { %p1486_p6 = scmp.ne.s32.totalorder %s1483_s28, 0 }
  0x39   : > { %p1487_p7 = scmp.ne.s32.totalorder (!%p1486_p6), %s1484_s29, 0 }
  0x3a   : > { %264 = sbr.rel (%p1486_p6) target bundleno = 846 (0x34e), region = 48 }
  0x41   : > { %1275 = dma.done.wait (%p1487_p7), [#allocation3], 8192  }
  0x42   : > { %1277 = vsyncadd (%p1487_p7), [#allocation3], 4294959104 }
  0x43   : > { %1279 = dma.done.wait (%p1487_p7), [#allocation5], 8192  }
  0x44   : > { %1281 = vsyncadd (%p1487_p7), [#allocation5], 4294959104  ;;  %s947_s9 = sshll.u32 %s938_s27, 1  ;;  %v356_v2 = vld [vmem:[#allocation2 + $0x8] sm:$0xff]  ;;  %v358_v4 = vld [vmem:[#allocation2 + $0x18] sm:$0xff] }
  0x45   : > { %p301_p2 = scmp.lt.s32.totalorder %s947_s9, 3  ;;  %v360_v3 = vld [vmem:[#allocation2 + $0x28] sm:$0xff]  ;;  %v362_v6 = vld [vmem:[#allocation2 + $0x38] sm:$0xff]  ;;  %v355_v7 = vld [vmem:[#allocation2] sm:$0xff] }
  0x46   : > { %v1032_v5 = vpack.c.bf16 %v360_v3, %v356_v2  ;;  %v359_v8 = vld [vmem:[#allocation2 + $0x20] sm:$0xff]  ;;  %v1064_v9 = vpack.c.bf16 %v362_v6, %v358_v4  ;;  %v357_v11 = vld [vmem:[#allocation2 + $0x10] sm:$0xff]  ;;  %v364_v13 = vld [vmem:[#allocation2 + $0x48] sm:$0xff] }
  0x47   : > { %s1489_s9 = smov (!%p301_p2, %s947_s9), 3  ;;  %v1034_v10 = vpack.c.bf16 %v359_v8, %v355_v7  ;;  %v361_v12 = vld [vmem:[#allocation2 + $0x30] sm:$0xff]  ;;  %v368_v15 = vld [vmem:[#allocation2 + $0x68] sm:$0xff]  ;;  %v366_v16 = vld [vmem:[#allocation2 + $0x58] sm:$0xff] }
  0x48   : > { %s948_s28 = sshll.u32 %s1489_s9, 3  ;;  %1033 = vmatprep.subr.bf16.mxu0 %v1032_v5  ;;  %v1066_v14 = vpack.c.bf16 %v361_v12, %v357_v11  ;;  %v370_v17 = vld [vmem:[#allocation2 + $0x78] sm:$0xff]  ;;  %1065 = vmatprep.subr.bf16.mxu1 %v1064_v9  ;;  %v1036_v18 = vpack.c.bf16 %v368_v15, %v364_v13  ;;  %v363_v20 = vld [vmem:[#allocation2 + $0x40] sm:$0xff]  ;;  %v365_v22 = vld [vmem:[#allocation2 + $0x50] sm:$0xff] }
  0x49   : > { %s304_s18 = scalar_lea.vmem %s1472_s0, %s948_s28  ;;  %1035 = vmatpush1.bf16.msra.mxu0 %v1034_v10  ;;  %v1068_v19 = vpack.c.bf16 %v370_v17, %v366_v16  ;;  %v367_v21 = vld [vmem:[#allocation2 + $0x60] sm:$0xff]  ;;  %v369_v24 = vld [vmem:[#allocation2 + $0x70] sm:$0xff]  ;;  %v372_v25 = vld [vmem:[#allocation2 + $0x88] sm:$0xff]  ;;  %s310_s11 = scalar_lea.vmem %s1479_s7, %s948_s28 }
  0x4a   : > { %v1428_v0 = vld [vmem:[%s304_s18] sm:$0xff]  ;;  %v1431_v1 = vld [vmem:[%s304_s18 + $0x8] sm:$0xff]  ;;  %1067 = vmatpush1.bf16.msra.mxu1 %v1066_v14  ;;  %v1038_v23 = vpack.c.bf16 %v367_v21, %v363_v20  ;;  %1037 = vmatprep.subr.bf16.mxu0 %v1036_v18  ;;  %v1070_v27 = vpack.c.bf16 %v369_v24, %v365_v22  ;;  %v374_v29 = vld [vmem:[#allocation2 + $0x98] sm:$0xff]  ;;  %v1292_v24 = vmov 0.0  }
  0x4b   : > { %316 = vadd.xlane.f32.xlu0 %v1428_v0  ;;  %v376_v26 = vld [vmem:[#allocation2 + $0xa8] sm:$0xff]  ;;  %1069 = vmatprep.subr.bf16.mxu1 %v1068_v19  ;;  %v378_v30 = vld [vmem:[#allocation2 + $0xb8] sm:$0xff]  ;;  %v371_v31 = vld [vmem:[#allocation2 + $0x80] sm:$0xff] }
  0x4c   : > { %v1040_v28 = vpack.c.bf16 %v376_v26, %v372_v25  ;;  %v1072_v32 = vpack.c.bf16 %v378_v30, %v374_v29  ;;  %v375_v33 = vld [vmem:[#allocation2 + $0xa0] sm:$0xff]  ;;  %v373_v34 = vld [vmem:[#allocation2 + $0x90] sm:$0xff]  ;;  %v380_v46 = vld [vmem:[#allocation2 + $0xc8] sm:$0xff]  ;;  %505 = vmatprep.mubr.f32.mxu0 %v1292_v24  ;;  %582 = vmatprep.mubr.f32.mxu1 %v1292_v24 }
  0x4d   : > { %v377_v35 = vld [vmem:[#allocation2 + $0xb0] sm:$0xff]  ;;  %1039 = vmatpush1.bf16.msra.mxu0 %v1038_v23  ;;  %v1042_v36 = vpack.c.bf16 %v375_v33, %v371_v31  ;;  %v384_v47 = vld [vmem:[#allocation2 + $0xe8] sm:$0xff]  ;;  %v382_v48 = vld [vmem:[#allocation2 + $0xd8] sm:$0xff] }
  0x4e   : > { %1071 = vmatpush1.bf16.msra.mxu1 %v1070_v27  ;;  %1041 = vmatprep.subr.bf16.mxu0 %v1040_v28  ;;  %v1074_v37 = vpack.c.bf16 %v377_v35, %v373_v34  ;;  %v1044_v49 = vpack.c.bf16 %v384_v47, %v380_v46  ;;  %v386_v50 = vld [vmem:[#allocation2 + $0xf8] sm:$0xff]  ;;  %v379_v51 = vld [vmem:[#allocation2 + $0xc0] sm:$0xff]  ;;  %v381_v55 = vld [vmem:[#allocation2 + $0xd0] sm:$0xff] }
  0x4f   : > { %318 = vadd.xlane.f32.xlu0 %v1431_v1  ;;  %1073 = vmatprep.subr.bf16.mxu1 %v1072_v32  ;;  %v383_v52 = vld [vmem:[#allocation2 + $0xe0] sm:$0xff]  ;;  %v1076_v53 = vpack.c.bf16 %v386_v50, %v382_v48  ;;  %v385_v56 = vld [vmem:[#allocation2 + $0xf0] sm:$0xff]  ;;  %v388_v58 = vld [vmem:[#allocation2 + $0x108] sm:$0xff] }
  0x50   : > { %v1046_v54 = vpack.c.bf16 %v383_v52, %v379_v51  ;;  %v1078_v57 = vpack.c.bf16 %v385_v56, %v381_v55  ;;  %v392_v59 = vld [vmem:[#allocation2 + $0x128] sm:$0xff]  ;;  %v390_v60 = vld [vmem:[#allocation2 + $0x118] sm:$0xff]  ;;  %v387_v63 = vld [vmem:[#allocation2 + $0x100] sm:$0xff] }
  0x51   : > { %1043 = vmatpush1.bf16.msra.mxu0 %v1042_v36  ;;  %v1048_v61 = vpack.c.bf16 %v392_v59, %v388_v58  ;;  %v394_v62 = vld [vmem:[#allocation2 + $0x138] sm:$0xff]  ;;  %v391_v2 = vld [vmem:[#allocation2 + $0x120] sm:$0xff]  ;;  %v389_v5 = vld [vmem:[#allocation2 + $0x110] sm:$0xff] }
  0x52   : > { %1075 = vmatpush1.bf16.msra.mxu1 %v1074_v37  ;;  %1045 = vmatprep.subr.bf16.mxu0 %v1044_v49  ;;  %v1080_v3 = vpack.c.bf16 %v394_v62, %v390_v60  ;;  %v1050_v4 = vpack.c.bf16 %v391_v2, %v387_v63  ;;  %v393_v6 = vld [vmem:[#allocation2 + $0x130] sm:$0xff]  ;;  %v396_v8 = vld [vmem:[#allocation2 + $0x148] sm:$0xff]  ;;  %v398_v10 = vld [vmem:[#allocation2 + $0x158] sm:$0xff] }
  0x53   : > { %1077 = vmatprep.subr.bf16.mxu1 %v1076_v53  ;;  %v1082_v7 = vpack.c.bf16 %v393_v6, %v389_v5  ;;  %v400_v9 = vld [vmem:[#allocation2 + $0x168] sm:$0xff]  ;;  %v402_v12 = vld [vmem:[#allocation2 + $0x178] sm:$0xff]  ;;  %v395_v13 = vld [vmem:[#allocation2 + $0x140] sm:$0xff] }
  0x54   : > { %v1052_v11 = vpack.c.bf16 %v400_v9, %v396_v8  ;;  %v399_v14 = vld [vmem:[#allocation2 + $0x160] sm:$0xff]  ;;  %v1084_v15 = vpack.c.bf16 %v402_v12, %v398_v10  ;;  %v397_v17 = vld [vmem:[#allocation2 + $0x150] sm:$0xff]  ;;  %v404_v19 = vld [vmem:[#allocation2 + $0x188] sm:$0xff] }
  0x55   : > { %1047 = vmatpush1.bf16.msra.mxu0 %v1046_v54  ;;  %v1054_v16 = vpack.c.bf16 %v399_v14, %v395_v13  ;;  %v401_v18 = vld [vmem:[#allocation2 + $0x170] sm:$0xff]  ;;  %v408_v21 = vld [vmem:[#allocation2 + $0x1a8] sm:$0xff]  ;;  %v406_v22 = vld [vmem:[#allocation2 + $0x198] sm:$0xff] }
  0x56   : > { %1079 = vmatpush1.bf16.msra.mxu1 %v1078_v57  ;;  %1049 = vmatprep.subr.bf16.mxu0 %v1048_v61  ;;  %v1086_v20 = vpack.c.bf16 %v401_v18, %v397_v17  ;;  %v410_v23 = vld [vmem:[#allocation2 + $0x1b8] sm:$0xff]  ;;  %v1056_v25 = vpack.c.bf16 %v408_v21, %v404_v19  ;;  %v403_v27 = vld [vmem:[#allocation2 + $0x180] sm:$0xff]  ;;  %v405_v29 = vld [vmem:[#allocation2 + $0x190] sm:$0xff] }
  0x57   : > { %1081 = vmatprep.subr.bf16.mxu1 %v1080_v3  ;;  %v1088_v26 = vpack.c.bf16 %v410_v23, %v406_v22  ;;  %v407_v28 = vld [vmem:[#allocation2 + $0x1a0] sm:$0xff]  ;;  %v409_v31 = vld [vmem:[#allocation2 + $0x1b0] sm:$0xff]  ;;  %v412_v32 = vld [vmem:[#allocation2 + $0x1c8] sm:$0xff] }
  0x58   : > { %v1058_v30 = vpack.c.bf16 %v407_v28, %v403_v27  ;;  %v416_v33 = vld [vmem:[#allocation2 + $0x1e8] sm:$0xff]  ;;  %v1090_v34 = vpack.c.bf16 %v409_v31, %v405_v29  ;;  %v414_v36 = vld [vmem:[#allocation2 + $0x1d8] sm:$0xff]  ;;  %v651_v47 = vld [vmem:[#allocation4 + $0x80] sm:$0xff] }
  0x59   : > { %1051 = vmatpush1.bf16.msra.mxu0 %v1050_v4  ;;  %v1060_v35 = vpack.c.bf16 %v416_v33, %v412_v32  ;;  %v418_v37 = vld [vmem:[#allocation2 + $0x1f8] sm:$0xff]  ;;  %v652_v48 = vld [vmem:[#allocation4 + $0x88] sm:$0xff]  ;;  %v683_v49 = vld [vmem:[#allocation4 + $0x180] sm:$0xff] }
  0x5a   : > { %1083 = vmatpush1.bf16.msra.mxu1 %v1082_v7  ;;  %1053 = vmatprep.subr.bf16.mxu0 %v1052_v11  ;;  %v1096_v50 = vpack.c.bf16 %v652_v48, %v651_v47  ;;  %v684_v51 = vld [vmem:[#allocation4 + $0x188] sm:$0xff]  ;;  %v951_v60 = vld [vmem:[%s1473_s1] ss:$0 sm:$0xff]  ;;  %v653_v5 = vld [vmem:[#allocation4 + $0x90] sm:$0xff] }
  0x5b   : > { %1085 = vmatprep.subr.bf16.mxu1 %v1084_v15  ;;  %v1128_v52 = vpack.c.bf16 %v684_v51, %v683_v49  ;;  %v952_v61 = vld [vmem:[%s1474_s2] ss:$0 sm:$0xff]  ;;  %v636_v2 = vld [vmem:[#allocation4 + $0x8] sm:$0xff]  ;;  %v654_v7 = vld [vmem:[#allocation4 + $0x98] sm:$0xff] }
  0x5c   : > { %v635_v63 = vld [vmem:[#allocation4] sm:$0xff]  ;;  %v668_v4 = vld [vmem:[#allocation4 + $0x108] sm:$0xff]  ;;  %v685_v8 = vld [vmem:[#allocation4 + $0x190] sm:$0xff]  ;;  %v1100_v17 = vpack.c.bf16 %v654_v7, %v653_v5 }
  0x5d   : > { %1055 = vmatpush1.bf16.msra.mxu0 %v1054_v16  ;;  %v667_v3 = vld [vmem:[#allocation4 + $0x100] sm:$0xff]  ;;  %v686_v9 = vld [vmem:[#allocation4 + $0x198] sm:$0xff]  ;;  %v1098_v13 = vpack.c.bf16 %v636_v2, %v635_v63  ;;  %v637_v15 = vld [vmem:[#allocation4 + $0x10] sm:$0xff] }
  0x5e   : > { %1087 = vmatpush1.bf16.msra.mxu1 %v1086_v20  ;;  %1057 = vmatprep.subr.bf16.mxu0 %v1056_v25  ;;  %v1130_v14 = vpack.c.bf16 %v668_v4, %v667_v3  ;;  %v638_v16 = vld [vmem:[#allocation4 + $0x18] sm:$0xff]  ;;  %v1132_v18 = vpack.c.bf16 %v686_v9, %v685_v8  ;;  %v655_v20 = vld [vmem:[#allocation4 + $0xa0] sm:$0xff]  ;;  %v656_v22 = vld [vmem:[#allocation4 + $0xa8] sm:$0xff] }
  0x5f   : > { %1089 = vmatprep.subr.bf16.mxu1 %v1088_v26  ;;  %v670_v19 = vld [vmem:[#allocation4 + $0x118] sm:$0xff]  ;;  %v687_v23 = vld [vmem:[#allocation4 + $0x1a0] sm:$0xff]  ;;  %v688_v25 = vld [vmem:[#allocation4 + $0x1a8] sm:$0xff]  ;;  %v1102_v26 = vpack.c.bf16 %v638_v16, %v637_v15  ;;  %v1104_v29 = vpack.c.bf16 %v656_v22, %v655_v20 }
  0x60   : > { %v639_v28 = vld [vmem:[#allocation4 + $0x20] sm:$0xff]  ;;  %v640_v31 = vld [vmem:[#allocation4 + $0x28] sm:$0xff]  ;;  %v674_v47 = vld [vmem:[#allocation4 + $0x138] sm:$0xff] }
  0x61   : > { %1059 = vmatpush1.bf16.msra.mxu0 %v1058_v30  ;;  %v1136_v30 = vpack.c.bf16 %v688_v25, %v687_v23  ;;  %v671_v32 = vld [vmem:[#allocation4 + $0x120] sm:$0xff]  ;;  %v672_v33 = vld [vmem:[#allocation4 + $0x128] sm:$0xff]  ;;  %v693_v63 = vld [vmem:[#allocation4 + $0x1d0] sm:$0xff] }
  0x62   : > { %1091 = vmatpush1.bf16.msra.mxu1 %v1090_v34  ;;  %1061 = vmatprep.subr.bf16.mxu0 %v1060_v35  ;;  %v1106_v34 = vpack.c.bf16 %v640_v31, %v639_v28  ;;  %v1138_v35 = vpack.c.bf16 %v672_v33, %v671_v32  ;;  %v659_v49 = vld [vmem:[#allocation4 + $0xc0] sm:$0xff]  ;;  %v694_v3 = vld [vmem:[#allocation4 + $0x1d8] sm:$0xff]  ;;  %v645_v4 = vld [vmem:[#allocation4 + $0x50] sm:$0xff] }
  0x63   : > { %v691_v51 = vld [vmem:[#allocation4 + $0x1c0] sm:$0xff]  ;;  %v646_v5 = vld [vmem:[#allocation4 + $0x58] sm:$0xff]  ;;  %v677_v8 = vld [vmem:[#allocation4 + $0x150] sm:$0xff] }
  0x64   : > { %v1118_v7 = vpack.c.bf16 %v646_v5, %v645_v4  ;;  %v678_v9 = vld [vmem:[#allocation4 + $0x158] sm:$0xff]  ;;  %v696_v15 = vld [vmem:[#allocation4 + $0x1e8] sm:$0xff]  ;;  %v647_v16 = vld [vmem:[#allocation4 + $0x60] sm:$0xff] }
  0x65   : > { %v680_v20 = vld [vmem:[#allocation4 + $0x168] sm:$0xff]  ;;  %v665_v22 = vld [vmem:[#allocation4 + $0xf0] sm:$0xff]  ;;  %v666_v23 = vld [vmem:[#allocation4 + $0xf8] sm:$0xff] }
  0x66   : > { %v697_v25 = vld [vmem:[#allocation4 + $0x1f0] sm:$0xff]  ;;  %v650_v28 = vld [vmem:[#allocation4 + $0x78] sm:$0xff] }
  0x67   : > { %v681_v31 = vld [vmem:[#allocation4 + $0x170] sm:$0xff]  ;;  %v682_v32 = vld [vmem:[#allocation4 + $0x178] sm:$0xff] }
  0x68   : > { %v1158_v33 = vpack.c.bf16 %v682_v32, %v681_v31 }
  0xd8   : > { %v317_v38 = vpop.xlane.xlu0 %316 }
  0xd9   : > { %v321_v39 = vmul.f32 0.0078125, %v317_v38  ;;  %v411_v38 = vld [vmem:[#allocation2 + $0x1c0] sm:$0xff] }
  0xdb   : > { %v1435_v40 = vsub.f32 %v1428_v0, %v321_v39  ;;  %v1092_v39 = vpack.c.bf16 %v418_v37, %v414_v36  ;;  %v658_v36 = vld [vmem:[#allocation4 + $0xb8] sm:$0xff]  ;;  %v689_v37 = vld [vmem:[#allocation4 + $0x1b0] sm:$0xff] }
  0xdc   : > { %v319_v41 = vpop.xlane.xlu0 %318 }
  0xdd   : > { %v322_v42 = vmul.f32 0.0078125, %v319_v41  ;;  %v325_v43 = vmul.f32 %v1435_v40, %v1435_v40  ;;  %v415_v41 = vld [vmem:[#allocation2 + $0x1e0] sm:$0xff]  ;;  %1093 = vmatprep.subr.bf16.mxu1 %v1092_v39  ;;  %v690_v39 = vld [vmem:[#allocation4 + $0x1b8] sm:$0xff] }
  0xdf   : > { %v1440_v44 = vsub.f32 %v1431_v1, %v322_v42  ;;  %327 = vadd.xlane.f32.xlu1 %v325_v43  ;;  %v413_v42 = vld [vmem:[#allocation2 + $0x1d0] sm:$0xff] }
  0xe0   : > { %v417_v43 = vld [vmem:[#allocation2 + $0x1f0] sm:$0xff] }
  0xe1   : > { %v326_v45 = vmul.f32 %v1440_v44, %v1440_v44  ;;  %v1094_v46 = vpack.c.bf16 %v417_v43, %v413_v42  ;;  %v642_v42 = vld [vmem:[#allocation4 + $0x38] sm:$0xff]  ;;  %v1140_v43 = vpack.c.bf16 %v690_v39, %v689_v37  ;;  %v419_v37 = vld [vmem:[%s1476_s4] sm:$0xf] }
  0xe3   : > { %329 = vadd.xlane.f32.xlu1 %v326_v45  ;;  %v1062_v45 = vpack.c.bf16 %v415_v41, %v411_v38  ;;  %1095 = vmatpush1.bf16.msra.mxu1 %v1094_v46  ;;  %v641_v41 = vld [vmem:[#allocation4 + $0x30] sm:$0xff] }
  0xe4   : > { %1129 = vmatprep.subr.bf16.mxu1 %v1128_v52  ;;  %v673_v46 = vld [vmem:[#allocation4 + $0x130] sm:$0xff] }
  0xe5   : > { %1063 = vmatpush1.bf16.msra.mxu0 %v1062_v45  ;;  %v1110_v45 = vpack.c.bf16 %v642_v42, %v641_v41  ;;  %v1142_v48 = vpack.c.bf16 %v674_v47, %v673_v46 }
  0xe6   : > { %1097 = vmatprep.subr.bf16.mxu0 %v1096_v50  ;;  %v660_v50 = vld [vmem:[#allocation4 + $0xc8] sm:$0xff] }
  0xe7   : > { %v1112_v52 = vpack.c.bf16 %v660_v50, %v659_v49 }
 0x16c   : > { %v328_v53 = vpop.xlane.xlu1 %327 }
 0x16d   : > { %v331_v54 = vmul.f32 0.0078125, %v328_v53  ;;  %v692_v53 = vld [vmem:[#allocation4 + $0x1c8] sm:$0xff] }
 0x16f   : > { %v333_v55 = vadd.f32 1e-05, %v331_v54  ;;  %v643_v54 = vld [vmem:[#allocation4 + $0x40] sm:$0xff] }
 0x170   : > { %v330_v56 = vpop.xlane.xlu1 %329 }
 0x171   : > { %1194 = vrsqrt.f32 %v333_v55  ;;  %v332_v57 = vmul.f32 0.0078125, %v330_v56  ;;  %v644_v55 = vld [vmem:[#allocation4 + $0x48] sm:$0xff]  ;;  %v1144_v56 = vpack.c.bf16 %v692_v53, %v691_v51 }
 0x173   : > { %v334_v58 = vadd.f32 1e-05, %v332_v57  ;;  %v1114_v57 = vpack.c.bf16 %v644_v55, %v643_v54 }
 0x175   : > { %1196 = vrsqrt.f32 %v334_v58  ;;  %v675_v58 = vld [vmem:[#allocation4 + $0x140] sm:$0xff] }
 0x17b   : > { %v1195_v59 = vpop.eup %1194 }
 0x17c   : > { %v337_v62 = vmul.f32 %v1195_v59, %v1435_v40  ;;  %v669_v40 = vld [vmem:[#allocation4 + $0x110] sm:$0xff]  ;;  %v676_v59 = vld [vmem:[#allocation4 + $0x148] sm:$0xff] }
 0x17d   : > { %v1134_v27 = vpack.c.bf16 %v670_v19, %v669_v40  ;;  %v679_v19 = vld [vmem:[#allocation4 + $0x160] sm:$0xff] }
 0x17e   : > { %v345_v6 = vmul.f32 %v951_v60, %v337_v62  ;;  %v662_v62 = vld [vmem:[#allocation4 + $0xd8] sm:$0xff] }
 0x17f   : > { %v1197_v10 = vpop.eup %1196 }
 0x180   : > { %v353_v11 = vadd.f32 %v952_v61, %v345_v6  ;;  %v338_v12 = vmul.f32 %v1197_v10, %v1440_v44  ;;  %v1148_v6 = vpack.c.bf16 %v694_v3, %v693_v63  ;;  %v1150_v10 = vpack.c.bf16 %v678_v9, %v677_v8 }
 0x182   : > { %506 = vmatmul.mubr.f32.vlgmr.msra.gmra.mrb[0].mxu0 %v353_v11  ;;  %583 = vmatmul.mubr.f32.vlgmr.msra.gmra.mrb[0].mxu1 %v353_v11  ;;  %v346_v21 = vmul.f32 %v951_v60, %v338_v12  ;;  %v1146_v60 = vpack.c.bf16 %v676_v59, %v675_v58  ;;  %v663_v11 = vld [vmem:[#allocation4 + $0xe0] sm:$0xff]  ;;  %v664_v12 = vld [vmem:[#allocation4 + $0xe8] sm:$0xff] }
 0x183   : > { %511 = vmatprep.mubr.f32.mxu0 %v1292_v24  ;;  %588 = vmatprep.mubr.f32.mxu1 %v1292_v24  ;;  %v657_v24 = vld [vmem:[#allocation4 + $0xb0] sm:$0xff] }
 0x184   : > { %v354_v44 = vadd.f32 %v952_v61, %v346_v21  ;;  %1099 = vmatpush3.bf16.msra.mxu0 %v1098_v13  ;;  %1131 = vmatpush3.bf16.msra.mxu1 %v1130_v14  ;;  %v1108_v38 = vpack.c.bf16 %v658_v36, %v657_v24  ;;  %v661_v61 = vld [vmem:[#allocation4 + $0xd0] sm:$0xff]  ;;  %v695_v13 = vld [vmem:[#allocation4 + $0x1e0] sm:$0xff]  ;;  %v1120_v14 = vpack.c.bf16 %v664_v12, %v663_v11 }
 0x185   : > { %1101 = vmatprep.subr.bf16.mxu0 %v1100_v17  ;;  %1133 = vmatprep.subr.bf16.mxu1 %v1132_v18  ;;  %v1116_v2 = vpack.c.bf16 %v662_v62, %v661_v61  ;;  %v648_v17 = vld [vmem:[#allocation4 + $0x68] sm:$0xff]  ;;  %v1152_v18 = vpack.c.bf16 %v696_v15, %v695_v13  ;;  %v1154_v21 = vpack.c.bf16 %v680_v20, %v679_v19 }
 0x186   : > { %512 = vmatmul.mubr.f32.gmra.mrb[2].mxu0 %v354_v44  ;;  %589 = vmatmul.mubr.f32.gmra.mrb[2].mxu1 %v354_v44  ;;  %v1122_v40 = vpack.c.bf16 %v648_v17, %v647_v16  ;;  %v1124_v44 = vpack.c.bf16 %v666_v23, %v665_v22 }
 0x188   : > { %1103 = vmatpush3.bf16.msra.mxu0 %v1102_v26  ;;  %1135 = vmatpush3.bf16.msra.mxu1 %v1134_v27  ;;  %v698_v26 = vld [vmem:[#allocation4 + $0x1f8] sm:$0xff]  ;;  %v649_v27 = vld [vmem:[#allocation4 + $0x70] sm:$0xff] }
 0x189   : > { %1105 = vmatprep.subr.bf16.mxu0 %v1104_v29  ;;  %1137 = vmatprep.subr.bf16.mxu1 %v1136_v30  ;;  %v1156_v29 = vpack.c.bf16 %v698_v26, %v697_v25  ;;  %v1126_v30 = vpack.c.bf16 %v650_v28, %v649_v27 }
 0x18c   : > { %1107 = vmatpush3.bf16.msra.mxu0 %v1106_v34  ;;  %1139 = vmatpush3.bf16.msra.mxu1 %v1138_v35  ;;  %v421_v34 = vlaneseq }
 0x18d   : > { %1109 = vmatprep.subr.bf16.mxu0 %v1108_v38  ;;  %1141 = vmatprep.subr.bf16.mxu1 %v1140_v43 }
 0x18e   : > { %v422_v35 = vshrl.u32 %v421_v34, 7 }
 0x190   : > { %1111 = vmatpush3.bf16.msra.mxu0 %v1110_v45  ;;  %1143 = vmatpush3.bf16.msra.mxu1 %v1142_v48  ;;  %v423_v24 = vsub.s32 0, %v422_v35  ;;  %v431_v36 = vsub.s32 2, %v422_v35  ;;  %v427_v38 = vsub.s32 1, %v422_v35  ;;  %v435_v39 = vsub.s32 3, %v422_v35 }
 0x191   : > { %1113 = vmatprep.subr.bf16.mxu0 %v1112_v52  ;;  %1145 = vmatprep.subr.bf16.mxu1 %v1144_v56 }
 0x192   : > { %v424_v41 = vrot.slane %v419_v37, %v423_v24  ;;  %v432_v42 = vrot.slane %v419_v37, %v431_v36  ;;  %v428_v43 = vrot.slane %v419_v37, %v427_v38  ;;  %v436_v45 = vrot.slane %v419_v37, %v435_v39 }
 0x194   : > { %1115 = vmatpush3.bf16.msra.mxu0 %v1114_v57  ;;  %1147 = vmatpush3.bf16.msra.mxu1 %v1146_v60 }
 0x195   : > { %1117 = vmatprep.subr.bf16.mxu0 %v1116_v2  ;;  %1149 = vmatprep.subr.bf16.mxu1 %v1148_v6 }
 0x198   : > { %1119 = vmatpush3.bf16.msra.mxu0 %v1118_v7  ;;  %1151 = vmatpush3.bf16.msra.mxu1 %v1150_v10 }
 0x199   : > { %1121 = vmatprep.subr.bf16.mxu0 %v1120_v14  ;;  %1153 = vmatprep.subr.bf16.mxu1 %v1152_v18 }
 0x19c   : > { %1123 = vmatpush3.bf16.msra.mxu0 %v1122_v40  ;;  %1155 = vmatpush3.bf16.msra.mxu1 %v1154_v21 }
 0x19d   : > { %1125 = vmatprep.subr.bf16.mxu0 %v1124_v44  ;;  %1157 = vmatprep.subr.bf16.mxu1 %v1156_v29 }
 0x1a0   : > { %1127 = vmatpush3.bf16.msra.mxu0 %v1126_v30  ;;  %1159 = vmatpush3.bf16.msra.mxu1 %v1158_v33 }
 0x255   : > { %v507_v46 = vpop.f32.mrb[0].mxu0  ;;  %v584_v47 = vpop.f32.mrb[0].mxu1 }
 0x256   : > { %v508_v48 = vadd.f32 %v507_v46, %v424_v41  ;;  %v585_v49 = vadd.f32 %v584_v47, %v432_v42  ;;  %v509_v50 = vpop.f32.mrb[1].mxu0  ;;  %v586_v51 = vpop.f32.mrb[1].mxu1 }
 0x257   : > { %v510_v52 = vadd.f32 %v509_v50, %v428_v43  ;;  %v587_v53 = vadd.f32 %v586_v51, %v436_v45 }
 0x258   : > { %v603_v54 = vmul.f32 0.70710677, %v508_v48  ;;  %v605_v55 = vmul.f32 0.70710677, %v585_v49  ;;  %v595_v16 = vmul.f32 0.5, %v508_v48  ;;  %v597_v19 = vmul.f32 0.5, %v585_v49 }
 0x259   : > { %v604_v56 = vmul.f32 0.70710677, %v510_v52  ;;  %v606_v57 = vmul.f32 0.70710677, %v587_v53  ;;  %v513_v58 = vpop.f32.mrb[2].mxu0  ;;  %v590_v59 = vpop.f32.mrb[2].mxu1 }
 0x25a   : > { %1198 = verf.f32 %v603_v54  ;;  %v514_v60 = vadd.f32 %v513_v58, %v424_v41  ;;  %v591_v61 = vadd.f32 %v590_v59, %v432_v42  ;;  %v515_v62 = vpop.f32.mrb[3].mxu0  ;;  %v592_v63 = vpop.f32.mrb[3].mxu1  ;;  %v596_v14 = vmul.f32 0.5, %v510_v52  ;;  %v953_v41 = vld [vmem:[%s1478_s6] ss:$0 sm:$0xff] }
 0x25b   : > { %1200 = verf.f32 %v605_v55  ;;  %v516_v2 = vadd.f32 %v515_v62, %v428_v43  ;;  %v593_v3 = vadd.f32 %v592_v63, %v436_v45  ;;  %v598_v17 = vmul.f32 0.5, %v587_v53 }
 0x25c   : > { %1202 = verf.f32 %v604_v56  ;;  %v607_v4 = vmul.f32 0.70710677, %v514_v60  ;;  %v609_v5 = vmul.f32 0.70710677, %v591_v61  ;;  %v599_v31 = vmul.f32 0.5, %v514_v60 }
 0x25d   : > { %1204 = verf.f32 %v606_v57  ;;  %v608_v6 = vmul.f32 0.70710677, %v516_v2  ;;  %v610_v7 = vmul.f32 0.70710677, %v593_v3  ;;  %v600_v29 = vmul.f32 0.5, %v516_v2 }
 0x25e   : > { %1206 = verf.f32 %v607_v4  ;;  %v602_v32 = vmul.f32 0.5, %v593_v3  ;;  %v601_v34 = vmul.f32 0.5, %v591_v61 }
 0x25f   : > { %1208 = verf.f32 %v609_v5 }
 0x260   : > { %1210 = verf.f32 %v608_v6 }
 0x261   : > { %1212 = verf.f32 %v610_v7 }
 0x264   : > { %v1199_v8 = vpop.eup %1198 }
 0x265   : > { %v1201_v9 = vpop.eup %1200  ;;  %v619_v11 = vadd.f32 1.0, %v1199_v8 }
 0x266   : > { %v1203_v10 = vpop.eup %1202  ;;  %v621_v13 = vadd.f32 1.0, %v1201_v9 }
 0x267   : > { %v1205_v12 = vpop.eup %1204  ;;  %v620_v15 = vadd.f32 1.0, %v1203_v10  ;;  %v627_v22 = vmul.f32 %v619_v11, %v595_v16 }
 0x268   : > { %v622_v18 = vadd.f32 1.0, %v1205_v12  ;;  %v1207_v40 = vpop.eup %1206  ;;  %v629_v44 = vmul.f32 %v621_v13, %v597_v19 }
 0x269   : > { %v628_v20 = vmul.f32 %v620_v15, %v596_v14  ;;  %v1209_v21 = vpop.eup %1208  ;;  %v623_v26 = vadd.f32 1.0, %v1207_v40 }
 0x26a   : > { %v630_v23 = vmul.f32 %v622_v18, %v598_v17  ;;  %v1211_v25 = vpop.eup %1210  ;;  %v625_v28 = vadd.f32 1.0, %v1209_v21 }
 0x26b   : > { %770 = vmatprep.mubr.f32.mxu0 %v628_v20  ;;  %v1213_v27 = vpop.eup %1212  ;;  %v624_v30 = vadd.f32 1.0, %v1211_v25  ;;  %v631_v36 = vmul.f32 %v623_v26, %v599_v31 }
 0x26c   : > { %845 = vmatprep.mubr.f32.mxu1 %v630_v23  ;;  %771 = vmatmul.mubr.f32.vlgmr.msra.gmra.mrb[4].mxu0 %v627_v22  ;;  %v626_v33 = vadd.f32 1.0, %v1213_v27  ;;  %v633_v37 = vmul.f32 %v625_v28, %v601_v34 }
 0x26d   : > { %846 = vmatmul.mubr.f32.vlgmr.msra.gmra.mrb[4].mxu1 %v629_v44  ;;  %v632_v35 = vmul.f32 %v624_v30, %v600_v29 }
 0x26e   : > { %v634_v24 = vmul.f32 %v626_v33, %v602_v32 }
 0x26f   : > { %775 = vmatprep.mubr.f32.mxu0 %v632_v35 }
 0x270   : > { %850 = vmatprep.mubr.f32.mxu1 %v634_v24  ;;  %776 = vmatmul.mubr.f32.gmra.mrb[6].mxu0 %v631_v36 }
 0x271   : > { %851 = vmatmul.mubr.f32.gmra.mrb[6].mxu1 %v633_v37 }
 0x33f   : > { %v988_v38 = vpop.f32.mrb[4].mxu0 }
 0x340   : > { %v1026_v39 = vpop.f32.mrb[4].mxu1  ;;  %v989_v42 = vpop.f32.mrb[5].mxu0 }
 0x341   : > { %v990_v43 = vadd.f32 %v989_v42, %v988_v38  ;;  %v1027_v45 = vpop.f32.mrb[5].mxu1 }
 0x342   : > { %v1028_v46 = vadd.f32 %v1027_v45, %v1026_v39 }
 0x343   : > { %v773_v47 = vadd.f32 %v990_v43, %v953_v41  ;;  %v991_v48 = vpop.f32.mrb[6].mxu0 }
 0x344   : > { %v1029_v50 = vpop.f32.mrb[6].mxu1  ;;  %v992_v51 = vpop.f32.mrb[7].mxu0 }
 0x345   : > { %v848_v49 = vadd.f32 %v1028_v46, %v773_v47  ;;  %v993_v52 = vadd.f32 %v992_v51, %v991_v48  ;;  %v1030_v53 = vpop.f32.mrb[7].mxu1 }
 0x346   : > { %v1031_v55 = vadd.f32 %v1030_v53, %v1029_v50 }
 0x347   : > { %v856_v54 = vadd.f32 %v848_v49, %v1428_v0  ;;  %v778_v56 = vadd.f32 %v993_v52, %v953_v41 }
 0x349   : > { %858 = vst [vmem:[%s310_s11] sm:$0xff] %v856_v54  ;;  %v853_v57 = vadd.f32 %v1031_v55, %v778_v56 }
 0x34b   : > { %v857_v58 = vadd.f32 %v853_v57, %v1431_v1 }
 0x34d   : > { %859 = vst [vmem:[%s310_s11 + $0x8] sm:$0xff] %v857_v58 }
 0x34e PF: > { %s19_s24 = sadd.s32 1, %s1284_s24  }
 0x34f   : > { %p16_p5 = scmp.ge.s32.totalorder %s19_s24, 4  }
 0x351   :  { %18 = sbr.rel (!%p16_p5) target bundleno = 2 (0x2), region = 87 }
 0x358   :  { %882 = vsyncpa [#allocation3], 1 }
 0x359   :  { %884 = vsyncpa [#allocation3 + $0x1], 1 }
 0x35a   :  { %885 = vsyncpa [#allocation5], 1 }

</bundles_post_ra>
